<compile_context>
chip_gen: v7x
topology: tpu7x:2x2x1
jax: 0.10.0
libtpu: 0.0.40
codegen_flags: <defaults>
</compile_context>

<pallas_src>
import jax
import jax.numpy as jnp
from jax.experimental import pallas as pl
from jax.experimental.pallas import tpu as pltpu

LANE = 128          # lane width
SUBLANE = 8         # sublane width
TM_MAX = 256        # max dst-node / row tile
TK_MAX = 256        # max src-node / reduction tile

_VMEM_LIMIT_CACHE = None


def _vmem_limit_bytes():
    """Per-generation scoped-VMEM budget (~38 MiB on v7x, ~76 MiB on v5e/v6e)."""
    global _VMEM_LIMIT_CACHE
    if _VMEM_LIMIT_CACHE is None:
        try:
            cap = int(pltpu.get_tpu_info().vmem_capacity_bytes)
        except Exception:
            cap = 128 * 1024 * 1024
        _VMEM_LIMIT_CACHE = min(int(cap * 0.6), 96 * 1024 * 1024)
    return _VMEM_LIMIT_CACHE


def _rup(n, m):
    return ((n + m - 1) // m) * m


def _pad2d(x, rows, cols):
    r, c = x.shape
    return jnp.pad(x, ((0, rows - r), (0, cols - c)))


def _row_tiling(m):
    """Pick (m_pad, tm) so the 'parallel' row axis has >=2 blocks when possible."""
    m_pad = _rup(max(m, 1), 2 * SUBLANE)
    if m_pad <= 2 * TM_MAX:
        return m_pad, m_pad // 2          # exactly 2 blocks, tm is a multiple of 8
    m_pad = _rup(m_pad, TM_MAX)
    return m_pad, TM_MAX


# ----------------------------------------------------------------------------
# Kernel 1: matmul (no bias) -- used for transform_lin
# ----------------------------------------------------------------------------
def _matmul_simple_kernel(x_ref, w_ref, o_ref):
    o_ref[...] = jnp.dot(x_ref[...], w_ref[...],
                         preferred_element_type=jnp.float32).astype(o_ref.dtype)


def _matmul_acc_kernel(x_ref, w_ref, o_ref, acc_ref):
    k = pl.program_id(1)

    @pl.when(k == 0)
    def _():
        acc_ref[...] = jnp.zeros_like(acc_ref)

    acc_ref[...] += jnp.dot(x_ref[...], w_ref[...],
                            preferred_element_type=jnp.float32)

    @pl.when(k == pl.num_programs(1) - 1)
    def _():
        o_ref[...] = acc_ref[...].astype(o_ref.dtype)


def matmul_nobias(x, w, vmem_limit, out_dtype=jnp.bfloat16):
    """(M,K)@(K,N) -> padded (M_pad, N_pad). Single-K fast path when K fits VMEM."""
    m, k = x.shape
    _, n = w.shape
    n_pad = _rup(n, LANE)
    m_pad, tm = _row_tiling(m)

    k_res = _rup(k, LANE)
    # resident weight + double-buffered x tiles must fit comfortably
    single_k = (k_res * n_pad * 2 + 2 * tm * k_res * 2) <= vmem_limit // 2

    if single_k:
        k_pad = k_res
        x_p = _pad2d(x, m_pad, k_pad).astype(jnp.bfloat16)
        w_p = _pad2d(w, k_pad, n_pad).astype(jnp.bfloat16)
        return pl.pallas_call(
            _matmul_simple_kernel,
            out_shape=jax.ShapeDtypeStruct((m_pad, n_pad), out_dtype),
            grid_spec=pltpu.PrefetchScalarGridSpec(
                num_scalar_prefetch=0,
                grid=(m_pad // tm,),
                in_specs=[pl.BlockSpec((tm, k_pad), lambda i: (i, 0)),
                          pl.BlockSpec((k_pad, n_pad), lambda i: (0, 0))],  # resident
                out_specs=pl.BlockSpec((tm, n_pad), lambda i: (i, 0))),
            compiler_params=pltpu.CompilerParams(
                dimension_semantics=("parallel",),
                vmem_limit_bytes=vmem_limit),
        )(x_p, w_p)

    tk = TK_MAX
    k_pad = _rup(k, tk)
    x_p = _pad2d(x, m_pad, k_pad).astype(jnp.bfloat16)
    w_p = _pad2d(w, k_pad, n_pad).astype(jnp.bfloat16)
    return pl.pallas_call(
        _matmul_acc_kernel,
        out_shape=jax.ShapeDtypeStruct((m_pad, n_pad), out_dtype),
        grid_spec=pltpu.PrefetchScalarGridSpec(
            num_scalar_prefetch=0,
            grid=(m_pad // tm, k_pad // tk),
            in_specs=[pl.BlockSpec((tm, tk), lambda i, kk: (i, kk)),
                      pl.BlockSpec((tk, n_pad), lambda i, kk: (kk, 0))],
            out_specs=pl.BlockSpec((tm, n_pad), lambda i, kk: (i, 0)),
            scratch_shapes=[pltpu.VMEM((tm, n_pad), jnp.float32)]),
        compiler_params=pltpu.CompilerParams(
            dimension_semantics=("parallel", "arbitrary"),
            vmem_limit_bytes=vmem_limit),
    )(x_p, w_p)


# ----------------------------------------------------------------------------
# Kernel 2: fused SAGEConv(concat=True) + ELU, tiled + pipelined
# ----------------------------------------------------------------------------
def _sage_layer_kernel(adj_ref, deg_ref, xs_ref, xt_ref, wl_ref, bl_ref, wr_ref,
                       o_ref, acc_ref):
    k = pl.program_id(1)
    h = wl_ref.shape[1]

    @pl.when(k == 0)
    def _():
        acc_ref[...] = jnp.zeros_like(acc_ref)
        # k-independent half of the epilogue, hoisted off the drain path:
        # concat([lin_r(x_target), ...]) with ELU(alpha=1).
        out_r = jnp.dot(xt_ref[...], wr_ref[...],
                        preferred_element_type=jnp.float32)
        o_ref[:, :h] = jnp.where(out_r > 0, out_r,
                                 jnp.expm1(out_r)).astype(o_ref.dtype)

    # streamed chunk of the unnormalized aggregation:
    # counts[i-tile, k-tile] @ x_src[k-tile]   (f32 accumulation)
    acc_ref[...] += jnp.dot(adj_ref[...], xs_ref[...],
                            preferred_element_type=jnp.float32)

    @pl.when(k == pl.num_programs(1) - 1)
    def _():
        # mean normalization in f32 via the EUP (approx reciprocal); deg>=1 guard
        inv_deg = pl.reciprocal(jnp.maximum(deg_ref[...], 1.0), approx=True)
        # bf16 cast for the MXU (inference-acceptable; f32 accumulation kept above)
        agg = (acc_ref[...] * inv_deg).astype(wl_ref.dtype)
        out_l = jnp.dot(agg, wl_ref[...],
                        preferred_element_type=jnp.float32) + bl_ref[...]
        o_ref[:, h:] = jnp.where(out_l > 0, out_l,
                                 jnp.expm1(out_l)).astype(o_ref.dtype)


def sage_layer(adj_counts, deg, x_src, w_l, b_l, w_r, n_dst, vmem_limit):
    """adj_counts: (n_dst, n_src_real) dense integer edge counts (f32 values).
       deg:        (n_dst, 1) f32 in-degree per dst node.
       x_src:      (rows>=n_src_real, d_in) features; padded rows unused.
       w_l, w_r:   (d_in, h) padded; b_l: (1, h) f32 padded.
       Returns (n_dst_pad, 2*h) bf16; only the first n_dst rows are meaningful."""
    n_dst_real, n_src_real = adj_counts.shape
    d_in = x_src.shape[1]
    h = w_l.shape[1]
    assert d_in % LANE == 0 and h % LANE == 0

    # dst ("parallel") tiling: >=2 blocks when possible (v7x megacore)
    n_dst_pad, tm = _row_tiling(n_dst)

    # src (reduction) tiling: VMEM-resident x_src (single K step) when it fits,
    # otherwise stream TK_MAX-deep tiles.
    n_src_min = max(n_src_real, n_dst_pad)     # targets are a prefix of sources
    n_src_res = _rup(n_src_min, SUBLANE)
    res_bytes = n_src_res * d_in * 2 + 2 * tm * n_src_res * 2
    if res_bytes <= vmem_limit // 2:
        tk = n_src_pad = n_src_res
    else:
        tk = TK_MAX
        n_src_pad = _rup(n_src_min, tk)
    assert n_dst_pad <= n_src_pad

    adj_p = _pad2d(adj_counts, n_dst_pad, n_src_pad).astype(jnp.bfloat16)  # exact ints
    deg_p = _pad2d(deg, n_dst_pad, 1).astype(jnp.float32)
    rows = x_src.shape[0]
    if rows < n_src_pad:
        x_p = jnp.pad(x_src, ((0, n_src_pad - rows), (0, 0)))
    else:
        x_p = x_src[:n_src_pad]
    x_p = x_p.astype(jnp.bfloat16)
    w_l_b = w_l.astype(jnp.bfloat16)
    w_r_b = w_r.astype(jnp.bfloat16)
    b_l_f = b_l.astype(jnp.float32)

    grid = (n_dst_pad // tm, n_src_pad // tk)
    return pl.pallas_call(
        _sage_layer_kernel,
        out_shape=jax.ShapeDtypeStruct((n_dst_pad, 2 * h), jnp.bfloat16),
        grid_spec=pltpu.PrefetchScalarGridSpec(
            num_scalar_prefetch=0,
            grid=grid,
            in_specs=[
                pl.BlockSpec((tm, tk), lambda i, k: (i, k)),     # adj tile (streamed)
                pl.BlockSpec((tm, 1), lambda i, k: (i, 0)),      # degree per dst tile
                pl.BlockSpec((tk, d_in), lambda i, k: (k, 0)),   # x_src (resident if K==1)
                pl.BlockSpec((tm, d_in), lambda i, k: (i, 0)),   # x_target prefix tile
                pl.BlockSpec((d_in, h), lambda i, k: (0, 0)),    # w_l (resident)
                pl.BlockSpec((1, h), lambda i, k: (0, 0)),       # b_l (resident)
                pl.BlockSpec((d_in, h), lambda i, k: (0, 0)),    # w_r (resident)
            ],
            out_specs=pl.BlockSpec((tm, 2 * h), lambda i, k: (i, 0)),
            scratch_shapes=[pltpu.VMEM((tm, d_in), jnp.float32)]),
        compiler_params=pltpu.CompilerParams(
            dimension_semantics=("parallel", "arbitrary"),
            vmem_limit_bytes=vmem_limit),
        # x_p is passed for both xs and xt; targets are a prefix of sources, so
        # the xt view is selected purely by its BlockSpec (one extra small DMA).
    )(adj_p, deg_p, x_p, x_p, w_l_b, b_l_f, w_r_b)


# ----------------------------------------------------------------------------
# Kernel 3: link scorer  score = [x0 | x1] @ [W_a ; W_b]  (one fused matmul)
# ----------------------------------------------------------------------------
def _link_score_kernel(x_ref, w_ref, o_ref):
    o_ref[...] = jnp.dot(x_ref[...], w_ref[...],
                         preferred_element_type=jnp.float32)


def link_score(xcat, w, vmem_limit):
    m, k = xcat.shape
    n = w.shape[1]
    n_pad = _rup(n, LANE)
    if m <= TM_MAX:
        tm = _rup(m, SUBLANE)
        m_pad = tm                      # single block for small link counts
    else:
        tm = TM_MAX
        m_pad = _rup(m, tm)
    x_p = _pad2d(xcat, m_pad, k).astype(jnp.bfloat16)
    w_p = _pad2d(w, k, n_pad).astype(jnp.bfloat16)
    out = pl.pallas_call(
        _link_score_kernel,
        out_shape=jax.ShapeDtypeStruct((m_pad, n_pad), jnp.float32),
        grid_spec=pltpu.PrefetchScalarGridSpec(
            num_scalar_prefetch=0,
            grid=(m_pad // tm,),
            in_specs=[pl.BlockSpec((tm, k), lambda i: (i, 0)),
                      pl.BlockSpec((k, n_pad), lambda i: (0, 0))],
            out_specs=pl.BlockSpec((tm, n_pad), lambda i: (i, 0))),
        compiler_params=pltpu.CompilerParams(
            dimension_semantics=("parallel",),
            vmem_limit_bytes=vmem_limit),
    )(x_p, w_p)
    return out[:m, :n]


# ----------------------------------------------------------------------------
# Glue (plain JAX): adjacency build, padding, parameter setup, forward
# ----------------------------------------------------------------------------
def build_adj_counts(edge_index, n_src, n_dst):
    """Dense edge-count matrix C[dst, src] and per-dst degree (mean = C@x / deg)."""
    src, dst = edge_index[0], edge_index[1]
    counts = jnp.zeros((n_dst, n_src), jnp.float32).at[dst, src].add(1.0)
    deg = counts.sum(axis=1, keepdims=True)
    return counts, deg


def _pad_concat_rows(w, hidden, h_pad):
    """Re-layout rows of a (2*hidden, n) weight whose input is the padded concat
    output [lin_r(h_pad) | lin_l(h_pad)] with real features at [0:hidden] and
    [h_pad:h_pad+hidden]."""
    n = w.shape[1]
    out = jnp.zeros((2 * h_pad, n), w.dtype)
    out = out.at[:hidden, :].set(w[:hidden])
    out = out.at[h_pad:h_pad + hidden, :].set(w[hidden:2 * hidden])
    return out


def init_params(key, in_channels, hidden, out_channels, num_layers):
    params = {"convs": []}
    k = key

    def nxt():
        nonlocal k
        k, sub = jax.random.split(k)
        return sub

    scale = 0.1
    params["w_transform"] = scale * jax.random.normal(
        nxt(), (in_channels, hidden), jnp.float32)
    for layer in range(num_layers):
        dim_in = hidden if layer == 0 else 2 * hidden   # concat doubles width after layer 0
        params["convs"].append({
            "w_l": scale * jax.random.normal(nxt(), (dim_in, hidden), jnp.float32),
            "b_l": scale * jax.random.normal(nxt(), (hidden,), jnp.float32),
            "w_r": scale * jax.random.normal(nxt(), (dim_in, hidden), jnp.float32),
        })
    params["w_lin"] = scale * jax.random.normal(
        nxt(), (4 * hidden, out_channels), jnp.float32)
    return params


def sage_forward(params, init_mat, adjs, link, n_id, hidden):
    h_pad = _rup(hidden, LANE)
    vmem_limit = _vmem_limit_bytes()

    # gather-before-transform: only transform the sampled mini-batch nodes.
    x_gather = init_mat[n_id]                                        # (n, in_ch)
    x = matmul_nobias(x_gather, params["w_transform"], vmem_limit)   # (n_pad, h_pad) bf16

    for i, (edge_index, size) in enumerate(adjs):
        n_src, n_dst = size
        counts, deg = build_adj_counts(edge_index, n_src, n_dst)     # exact int counts
        p = params["convs"][i]
        d_in = x.shape[1]                                            # h_pad or 2*h_pad
        if i == 0:
            w_l = _pad2d(p["w_l"], d_in, h_pad)
            w_r = _pad2d(p["w_r"], d_in, h_pad)
        else:
            w_l = _pad2d(_pad_concat_rows(p["w_l"], hidden, h_pad), d_in, h_pad)
            w_r = _pad2d(_pad_concat_rows(p["w_r"], hidden, h_pad), d_in, h_pad)
        b_l = _pad2d(p["b_l"].reshape(1, -1), 1, h_pad)
        x = sage_layer(counts, deg, x, w_l, b_l, w_r, n_dst, vmem_limit)
        # TODO(synk): F.dropout skipped (inference mode, training=False -> identity)

    # row positions of link endpoints inside n_id (eager check when not traced).
    hits0 = (n_id[None, :] == link[:, 0][:, None])
    hits1 = (n_id[None, :] == link[:, 1][:, None])
    try:
        ok = bool(jnp.all(hits0.any(axis=1)) & jnp.all(hits1.any(axis=1)))
    except Exception:
        ok = True   # traced: skip the eager presence check
    assert ok, "every link endpoint must be present in n_id"
    idx0 = jnp.argmax(hits0, axis=1)
    idx1 = jnp.argmax(hits1, axis=1)

    # fused link scorer: [x0 | x1] @ [W_a ; W_b]  (lane-stacked, one matmul)
    xcat = jnp.concatenate([x[idx0], x[idx1]], axis=1)               # (links, 4*h_pad)
    w_a = _pad_concat_rows(params["w_lin"][:2 * hidden], hidden, h_pad)
    w_b = _pad_concat_rows(params["w_lin"][2 * hidden:], hidden, h_pad)
    w_full = jnp.concatenate([w_a, w_b], axis=0)                     # (4*h_pad, out_ch)
    out = link_score(xcat, w_full, vmem_limit)                       # (links, out_ch) f32
    if out.shape[1] == 1:                                            # torch .squeeze(1)
        out = jnp.squeeze(out, axis=1)
    return out


# ----------------------------------------------------------------------------
# Example run
# ----------------------------------------------------------------------------
if __name__ == "__main__":
    in_channels, hidden, out_channels, num_layers = 16, 32, 1, 2

    key = jax.random.PRNGKey(0)
    k_feat, k_perm, k_e0s, k_e0d, k_e1s, k_e1d, k_par = jax.random.split(key, 7)

    n_total = 40
    init_mat = jax.random.normal(k_feat, (n_total, in_channels), jnp.float32)

    # sampled node ids (as produced by a neighbor sampler); first 4 are targets
    n_id = jax.random.permutation(k_perm, n_total)[:12]

    # 2-hop bipartite adjacency stack: (12 src -> 8 dst), then (8 src -> 4 dst)
    e0 = jnp.stack([jax.random.randint(k_e0s, (24,), 0, 12),
                    jax.random.randint(k_e0d, (24,), 0, 8)])
    e1 = jnp.stack([jax.random.randint(k_e1s, (12,), 0, 8),
                    jax.random.randint(k_e1d, (12,), 0, 4)])
    adjs = [(e0, (12, 8)), (e1, (8, 4))]

    # links between final target nodes (ids taken from n_id[:4])
    link = jnp.stack([jnp.array([n_id[0], n_id[1]]),
                      jnp.array([n_id[2], n_id[3]])])

    params = init_params(k_par, in_channels, hidden, out_channels, num_layers)

    out = sage_forward(params, init_mat, adjs, link, n_id, hidden)
    jax.block_until_ready(out)
    assert out.shape == (2,)
    print("KERNEL_OK")
</pallas_src>

<mosaic_0001>
module attributes {stable_mosaic.version = 11 : i64} {
  func.func @_matmul_simple_kernel(%arg0: i32, %arg1: memref<8x128xbf16, #tpu.memory_space<vmem>>, %arg2: memref<128x128xbf16, #tpu.memory_space<vmem>>, %arg3: memref<8x128xbf16, #tpu.memory_space<vmem>>) attributes {dimension_semantics = [#tpu.dimension_semantics<parallel>], iteration_bounds = array<i64: 2>, scalar_prefetch = 0 : i64, scratch_operands = 0 : i64, tpu.core_type = #tpu.core_type<tc>, window_params = [{transform_indices = @transform_0, window_bounds = array<i64: 8, 128>}, {pipeline_mode = #tpu.pipeline_mode<synchronous>, transform_indices = @transform_1, window_bounds = array<i64: 128, 128>}, {transform_indices = @transform_2, window_bounds = array<i64: 8, 128>}]} {
    %c0 = arith.constant 0 : index
    %c0_0 = arith.constant 0 : index
    %0 = vector.load %arg1[%c0, %c0_0] : memref<8x128xbf16, #tpu.memory_space<vmem>>, vector<8x128xbf16>
    %c0_1 = arith.constant 0 : index
    %c0_2 = arith.constant 0 : index
    %1 = vector.load %arg2[%c0_1, %c0_2] : memref<128x128xbf16, #tpu.memory_space<vmem>>, vector<128x128xbf16>
    %cst = arith.constant dense<0.000000e+00> : vector<8x128xf32>
    %2 = tpu.matmul %0, %1, %cst {dimension_numbers = #tpu.dot_dimension_numbers<[1], [0], [0], [1], [0, 0, 1, 1], [], []>} : vector<8x128xbf16>, vector<128x128xbf16>, vector<8x128xf32> -> vector<8x128xf32>
    %3 = arith.truncf %2 : vector<8x128xf32> to vector<8x128xbf16>
    %c0_3 = arith.constant 0 : index
    %c0_4 = arith.constant 0 : index
    %4 = vector.load %arg3[%c0_3, %c0_4] : memref<8x128xbf16, #tpu.memory_space<vmem>>, vector<8x128xbf16>
    tpu.vector_store %arg3[%c0_3, %c0_4], %3 {strides = array<i32>} : memref<8x128xbf16, #tpu.memory_space<vmem>>, vector<8x128xbf16>,
    return
  }
  func.func @transform_0(%arg0: i32) -> (i32, i32) {
    %c0_i32 = arith.constant 0 : i32
    %c0_i32_0 = arith.constant 0 : i32
    return %arg0, %c0_i32 : i32, i32
  }
  func.func @transform_1(%arg0: i32) -> (i32, i32) {
    %c0_i32 = arith.constant 0 : i32
    %c0_i32_0 = arith.constant 0 : i32
    %c0_i32_1 = arith.constant 0 : i32
    return %c0_i32, %c0_i32_0 : i32, i32
  }
  func.func @transform_2(%arg0: i32) -> (i32, i32) {
    %c0_i32 = arith.constant 0 : i32
    %c0_i32_0 = arith.constant 0 : i32
    return %arg0, %c0_i32 : i32, i32
  }
}

</mosaic_0001>

<bundles_post_ra>
// kernel: tpu_custom_call.1
= control target key start
LH: loop header
LB: loop body
LE: loop exit
PB: predicated region body
PF: predicated region fallthrough
CT: control target
= control target key end

     0   :  { %7 = vsyncpa [#allocation3], 0  ;;  %s851_s0 = inlined_call_operand.hbm [shape: bf16[16,128], index: 0, kind: input, shape index: {}]   ;;  %s852_s1 = inlined_call_operand.hbm [shape: bf16[128,128], index: 1, kind: input, shape index: {}]   ;;  %s853_s2 = inlined_call_operand.hbm [shape: bf16[16,128], index: 2, kind: output, shape index: {}]  }
   0x1   :  { %9 = vsyncpa [#allocation3 + $0x1], 0 }
   0x2   :  { %10 = vsyncpa [#allocation6], 0 }
   0x3   :  { %11 = vsyncpa [#allocation4], 0 }
   0x4   :  { %13 = vsyncpa [#allocation4 + $0x1], 0  ;;  %s648_s9 = smov 0   ;;  %s650_s10 = smov 0  }
   0x5   :  { %s652_s11 = smov 0   ;;  %s654_s12 = smov 0  }
   0x6 LB: > { %s669_s13 = sadd.s32 4294967295, %s624_s12   ;;  %s376_s14 = sadd.s32 4294967294, %s624_s12   ;;  %s624_s12 = sphi %s654_s12, %s873_s12   ;;  %s620_s11 = sphi %s652_s11, %s872_s11   ;;  %s616_s10 = sphi %s650_s10, %s871_s10   ;;  %s612_s9 = sphi %s648_s9, %s870_s9  }
   0x7   : > { %p39_p0 = scmp.ne.s32.totalorder %s616_s10, %s612_s9  ;;  %p854_p1 = scmp.eq.s32.totalorder %s669_s13, 0 }
   0x8   : > { %p90_p3 = scmp.eq.s32.totalorder %s376_s14, 1  ;;  %p377_p5 = scmp.ge.s32.totalorder %s624_s12, 1 }
   0x9   : > { %p678_p4 = por %p854_p1, %p39_p0  ;;  %p97_p7 = scmp.lt.s32.totalorder %s624_s12, 3 }
   0xa   : > { %p683_p6 = por %p90_p3, %p39_p0  ;;  %s626_s18 = smov [#allocation5]  }
   0xb   : > { %s857_s15 = scalar_select %p678_p4, 1, 0 }
   0xc   : > { %s858_s16 = scalar_select %p683_p6, 1, 0 }
   0xd   : > { %p688_p8 = pnand %p377_p5, %p97_p7  ;;  %s109_s19 = sshll.u32 %s626_s18, 4  ;;  %s692_s19 = int_to_ptr.vmem [resolvable:$true] %s109_s19 }
   0xe   : > { %s704_s21 = sadd.s32 1, %s624_s12   ;;  %s26_s22 = sadd.s32 1, %s620_s11 }
   0xf   : > { %s859_s17 = scalar_select %p688_p8, 1, 0 }
  0x10   : > { %p435_p9 = pneg %p688_p8  ;;  %s23_s23 = ssub.s32 %s624_s12, %s704_s21 }
  0x11   : > { %s496_s26 = scalar_lea.hbm %s852_s1, 1024 }
  0x12   : > { %p699_p11 = pnand %p435_p9, %p854_p1  ;;  %p497_p12 = scmp.ne.s32.totalorder %s852_s1, %s496_s26 }
  0x13   : > { %p503_p5 = scmp.lt.u32.totalorder %s496_s26, %s852_s1 }
  0x14   : > { %p498_p13 = pneg %p699_p11 }
  0x16   : > { %p499_p0 = pnand %p498_p13, %p497_p12 }
  0x18   : > { %p500_p3 = pneg %p499_p0 }
  0x1a   : > { %p505_p7 = pnand %p503_p5, %p500_p3 }
  0x1c   : > { %508 = shalt.err (!%p505_p7)
}
  0x1d   : > { %s509_s3 = scalar_lea.vmem %s692_s19, 1024  ;;  %p517_p2 = scmp.lt.s32.totalorder %s692_s19, %s692_s19 }
  0x1e   : > { %p510_p9 = scmp.ne.s32.totalorder %s692_s19, %s509_s3  ;;  %p518_p6 = scmp.lt.s32.totalorder %s509_s3, %s509_s3 }
  0x20   : > { %p512_p10 = pnand %p510_p9, %p498_p13  ;;  %p519_p4 = por %p518_p6, %p517_p2 }
  0x22   : > { %p513_p1 = pneg %p512_p10 }
  0x24   : > { %p520_p8 = pnand %p519_p4, %p513_p1 }
  0x26   : > { %523 = shalt.err (!%p520_p8)
}
  0x27   : > { %s627_s4 = smov 64   ;;  %s628_s5 = smov 4  }
  0x28   : > { %438 = dma.hbm_to_vmem [thread:$0]  (!%p699_p11), %s852_s1, 1024, %s692_s19, [#allocation6], %s627_s4, %s627_s4, %s628_s5  }
  0x29   : > { %p24_p2 = scmp.eq.s32.totalorder %s23_s23, 0  ;;  %p33_p1 = scmp.ne.s32.totalorder %s620_s11, %s616_s10 }
  0x2a   : > { %p34_p4 = scmp.eq.s32.totalorder %s624_s12, 0  ;;  %p448_p6 = scmp.lt.s32.totalorder %s624_s12, 2 }
  0x2b   : > { %s735_s8 = scalar_select %p24_p2, %s620_s11, %s26_s22  }
  0x2c   : > { %p35_p8 = por %p34_p4, %p33_p1  ;;  %p861_p10 = scmp.eq.s32.totalorder %s669_s13, 1 }
  0x2d   : > { %s123_s18 = sand.u32 1, %s620_s11   ;;  %s381_s24 = sshll.u32 %s624_s12, 6 }
  0x2e   : > { %p739_p12 = por %p861_p10, %p33_p1  ;;  %s380_s25 = sshll.u32 %s123_s18, 2 }
  0x2f   : > { %s748_s27 = scalar_lea.hbm %s851_s0, %s381_s24  ;;  %s127_s19 = scalar_lea.vmem [#allocation2], %s380_s25 }
  0x30   : > { %s134_s22 = sshll.u32 %s127_s19, 4  ;;  %p750_p11 = pnand %p448_p6, %p35_p8  ;;  %s754_s22 = int_to_ptr.vmem [resolvable:$true] %s134_s22 }
  0x31   : > { %s124_s28 = scalar_lea.sflag [#allocation3], %s123_s18  ;;  %s524_s29 = scalar_lea.hbm %s748_s27, 64 }
  0x32   : > { %p525_p13 = scmp.ne.s32.totalorder %s748_s27, %s524_s29  ;;  %p526_p0 = pneg %p750_p11 }
  0x33   : > { %s529_s4 = scalar_lea.hbm %s851_s0, 128  ;;  %p530_p7 = scmp.lt.u32.totalorder %s748_s27, %s851_s0 }
  0x34   : > { %p527_p3 = pnand %p526_p0, %p525_p13  ;;  %p531_p9 = scmp.lt.u32.totalorder %s529_s4, %s524_s29 }
  0x35   : > { %p533_p1 = scmp.lt.u32.totalorder %s524_s29, %s748_s27 }
  0x36   : > { %p528_p5 = pneg %p527_p3  ;;  %p532_p2 = por %p531_p9, %p530_p7 }
  0x38   : > { %p534_p4 = por %p533_p1, %p532_p2 }
  0x3a   : > { %p535_p6 = pnand %p534_p4, %p528_p5 }
  0x3c   : > { %538 = shalt.err (!%p535_p6)
}
  0x3d   : > { %s539_s7 = scalar_lea.vmem %s754_s22, 64  ;;  %s629_s18 = smov [#allocation2]  }
  0x3e   : > { %p540_p8 = scmp.ne.s32.totalorder %s754_s22, %s539_s7  ;;  %s544_s24 = sshll.u32 %s629_s18, 4  ;;  %s545_s24 = int_to_ptr.vmem [resolvable:$false] %s544_s24 }
  0x3f   : > { %s546_s25 = scalar_lea.vmem %s545_s24, 128  ;;  %p547_p3 = scmp.lt.s32.totalorder %s754_s22, %s545_s24 }
  0x40   : > { %p542_p10 = pnand %p540_p8, %p526_p0  ;;  %p548_p7 = scmp.lt.s32.totalorder %s546_s25, %s539_s7 }
  0x42   : > { %p543_p13 = pneg %p542_p10  ;;  %p549_p9 = por %p548_p7, %p547_p3 }
  0x44   : > { %p550_p2 = pnand %p549_p9, %p543_p13 }
  0x46   : > { %553 = shalt.err (!%p550_p2)
}
  0x47   : > { %442 = dma.hbm_to_vmem [thread:$0]  (!%p750_p11), %s748_s27, 64, %s754_s22, %s124_s28  }
  0x48   : > { %p864_p5 = scmp.ne.s32.totalorder %s859_s17, 0 }
  0x49   : > { %s784_s20 = sand.u32 (!%p864_p5), 1, %s616_s10   ;;  %p865_p0 = scmp.ne.s32.totalorder (!%p864_p5), %s857_s15, 0 }
  0x4a   : > { %143 = sbr.rel (%p864_p5) target bundleno = 346 (0x15a), region = 28  ;;  %s383_s26 = sshll.u32 (!%p864_p5), %s784_s20, 2 }
  0x4b   : > { %s146_s19 = scalar_lea.sflag (!%p864_p5), [#allocation3], %s784_s20  ;;  %s790_s29 = scalar_lea.vmem (!%p864_p5), [#allocation2], %s383_s26 }
  0x51   : > { %599 = dma.done.wait (%p865_p0), %s146_s19, 64  }
  0x52   : > { %601 = vsyncadd (%p865_p0), %s146_s19, 4294967232  ;;  %p866_p11 = scmp.eq.s32.totalorder %s669_s13, 0 }
  0x54   : > { %603 = dma.done.wait (%p866_p11), [#allocation6], 1024   ;;  %p867_p1 = pmov %p866_p11 }
  0x55   : > { %v630_v0 = vmov 0.0   ;;  %vm631_vm0 = vmmov 0   ;;  %v488_v1 = vld [vmem:[#allocation5] sm:$0xff]   ;;  %v489_v2 = vld [vmem:[#allocation5 + $0x8] sm:$0xff]   ;;  %v490_v3 = vld [vmem:[#allocation5 + $0x10] sm:$0xff]   ;;  %s395_s15 = sshll.u32 %s669_s13, 6 }
  0x56   : > { %605 = vsyncadd (%p867_p1), [#allocation6], 4294966272  ;;  %407 = vmatprep.subr.bf16.mxu0 %v630_v0  ;;  %423 = vmatprep.mubr.msk.bf16.mxu0 %vm631_vm0, %v630_v0  ;;  %v491_v4 = vld [vmem:[#allocation5 + $0x18] sm:$0xff]   ;;  %v492_v5 = vld [vmem:[#allocation5 + $0x20] sm:$0xff]   ;;  %s173_s17 = scalar_lea.vmem [#allocation7], %s383_s26  ;;  %s807_s28 = scalar_lea.hbm %s853_s2, %s395_s15 }
  0x57   : > { %408 = vmatpush3.bf16.msra.mxu0 %v488_v1  ;;  %v493_v6 = vld [vmem:[#allocation5 + $0x28] sm:$0xff]   ;;  %v494_v7 = vld [vmem:[#allocation5 + $0x30] sm:$0xff]   ;;  %v495_v8 = vld [vmem:[#allocation5 + $0x38] sm:$0xff]   ;;  %s296_s27 = sshll.u32 %s173_s17, 4  ;;  %s283_s13 = scalar_lea.sflag [#allocation4], %s784_s20  ;;  %s809_s27 = int_to_ptr.vmem [resolvable:$true] %s296_s27 }
  0x58   : > { %409 = vmatprep.subr.bf16.mxu0 %v630_v0  ;;  %v175_v9 = vld [vmem:[%s790_s29] sm:$0xf]  ;;  %s554_s30 = scalar_lea.vmem %s809_s27, 64  ;;  %s632_s3 = smov [#allocation7]  }
  0x59   : > { %p555_p4 = scmp.ne.s32.totalorder %s809_s27, %s554_s30  ;;  %s558_s4 = sshll.u32 %s632_s3, 4  ;;  %s559_s4 = int_to_ptr.vmem [resolvable:$false] %s558_s4 }
  0x5a   : > { %s560_s5 = scalar_lea.vmem %s559_s4, 128  ;;  %p561_p10 = scmp.lt.s32.totalorder %s809_s27, %s559_s4 }
  0x5b   : > { %410 = vmatpush3.bf16.msra.mxu0 %v489_v2  ;;  %p556_p6 = pnand %p555_p4, %p739_p12  ;;  %p562_p13 = scmp.lt.s32.totalorder %s560_s5, %s554_s30 }
  0x5c   : > { %411 = vmatprep.subr.bf16.mxu0 %v630_v0 }
  0x5d   : > { %p557_p8 = pneg %p556_p6  ;;  %p563_p3 = por %p562_p13, %p561_p10 }
  0x5f   : > { %412 = vmatpush3.bf16.msra.mxu0 %v490_v3  ;;  %p564_p7 = pnand %p563_p3, %p557_p8 }
  0x60   : > { %413 = vmatprep.subr.bf16.mxu0 %v630_v0 }
  0x63   : > { %414 = vmatpush3.bf16.msra.mxu0 %v491_v4 }
  0x64   : > { %415 = vmatprep.subr.bf16.mxu0 %v630_v0 }
  0x67   : > { %416 = vmatpush3.bf16.msra.mxu0 %v492_v5 }
  0x68   : > { %417 = vmatprep.subr.bf16.mxu0 %v630_v0 }
  0x6b   : > { %418 = vmatpush3.bf16.msra.mxu0 %v493_v6 }
  0x6c   : > { %419 = vmatprep.subr.bf16.mxu0 %v630_v0 }
  0x6f   : > { %420 = vmatpush3.bf16.msra.mxu0 %v494_v7 }
  0x70   : > { %421 = vmatprep.subr.bf16.mxu0 %v630_v0 }
  0x73   : > { %422 = vmatpush3.bf16.msra.mxu0 %v495_v8 }
  0x76   : > { %424 = vmatmul.mubr.bf16.vlgmr.msra.gmra.mrb[0].mxu0 %v175_v9 }
 0x149   : > { %v274_v10 = vpop.f32.mrb[0].mxu0 }
 0x14a   : > { %v280_v11 = vpack.c.bf16 %v274_v10, %v274_v10  ;;  %v425_v12 = vpop.f32.mrb[1].mxu0 }
 0x14b   : > { %v277_v13 = vpop.f32.mrb[2].mxu0 }
 0x14c   : > { %281 = vst [vmem:[%s173_s17] sm:$0xf] %v280_v11  ;;  %v426_v14 = vpop.f32.mrb[3].mxu0 }
 0x14d   : > { %567 = shalt.err (!%p564_p7)
}
 0x14e   : > { %s568_s6 = scalar_lea.hbm %s807_s28, 64  ;;  %s572_s24 = scalar_lea.hbm %s853_s2, 128 }
 0x14f   : > { %p569_p9 = scmp.ne.s32.totalorder %s807_s28, %s568_s6  ;;  %p573_p0 = scmp.lt.u32.totalorder %s807_s28, %s853_s2 }
 0x150   : > { %p574_p11 = scmp.lt.u32.totalorder %s572_s24, %s568_s6  ;;  %p576_p4 = scmp.lt.u32.totalorder %s568_s6, %s807_s28 }
 0x151   : > { %p570_p2 = pnand %p569_p9, %p739_p12 }
 0x152   : > { %p575_p1 = por %p574_p11, %p573_p0 }
 0x153   : > { %p571_p5 = pneg %p570_p2 }
 0x154   : > { %p577_p6 = por %p576_p4, %p575_p1 }
 0x156   : > { %p578_p8 = pnand %p577_p6, %p571_p5 }
 0x158   : > { %581 = shalt.err (!%p578_p8)
}
 0x159   : > { %433 = dma.vmem_to_hbm [thread:$0]  (%p739_p12), %s809_s27, 64, %s807_s28, %s283_s13  }
 0x15a PF: > { %s308_s26 = sand.u32 1, %s612_s9   ;;  %p868_p10 = scmp.ne.s32.totalorder %s858_s16, 0 }
 0x15b   : > { %p869_p13 = scmp.ge.s32.totalorder %s624_s12, 2  ;;  %s309_s19 = scalar_lea.sflag [#allocation4], %s308_s26 }
 0x15d   : > { %p444_p3 = pnand %p869_p13, %p868_p10 }
 0x15f   : > { %607 = dma.done.wait (!%p444_p3), %s309_s19, 64  }
 0x160   : > { %609 = vsyncadd (!%p444_p3), %s309_s19, 4294967232  ;;  %p16_p7 = scmp.ge.s32.totalorder %s704_s21, 4   ;;  %s870_s9 = smov %s616_s10 }
 0x161   : > { %s871_s10 = smov %s620_s11  ;;  %s872_s11 = smov %s735_s8 }
 0x162   : > { %s873_s12 = smov %s704_s21  ;;  %18 = sbr.rel (!%p16_p7) target bundleno = 6 (0x6), region = 77 }
 0x169   :  { %314 = vsyncpa [#allocation3], 1 }
 0x16a   :  { %316 = vsyncpa [#allocation3 + $0x1], 1 }
 0x16b   :  { %317 = vsyncpa [#allocation6], 1 }
 0x16c   :  { %318 = vsyncpa [#allocation4], 1 }
 0x16d   :  { %320 = vsyncpa [#allocation4 + $0x1], 1 }

</bundles_post_ra>
